<compile_context>
chip_gen: v6e
topology: v6e:2x2x1
jax: 0.10.0
libtpu: 0.0.40
codegen_flags: <defaults>
</compile_context>

<pallas_src>
import functools

import jax
import jax.numpy as jnp
from jax.experimental import pallas as pl
from jax.experimental.pallas import tpu as pltpu

_D = 128  # feature dim fixed by the 128x128 weights of the reference module


# ----------------------------------------------------------------------------- helpers
def _kl_rows(t, im):
    """t, im: (rows, d) f32 logits.

    Returns (rows, 1) f32 per-row  KL(softmax(t)||softmax(m)) + KL(softmax(im)||softmax(m)),
    with m = (t + im) / 2.
    """
    max_t = jnp.max(t, axis=-1, keepdims=True)
    max_i = jnp.max(im, axis=-1, keepdims=True)
    zt = t - max_t
    zi = im - max_i

    # m - (max_t+max_i)/2 == (zt+zi)/2, and (max_t+max_i)/2 >= max(m), so this
    # shift is numerically safe and skips a third 128-lane max reduction.
    ms = (zt + zi) * 0.5
    log_m = ms - jnp.log(jnp.sum(jnp.exp(ms), axis=-1, keepdims=True))

    et = jnp.exp(zt)                                   # shared between softmax & log_softmax
    st = jnp.sum(et, axis=-1, keepdims=True)
    log_p = zt - jnp.log(st)
    ei = jnp.exp(zi)
    si = jnp.sum(ei, axis=-1, keepdims=True)
    log_q = zi - jnp.log(si)

    # softmax prob = e/s; divide AFTER the lane reduce ((rows,1) op, not (rows,128)).
    kl1 = jnp.sum(et * (log_p - log_m), axis=-1, keepdims=True) / st
    kl2 = jnp.sum(ei * (log_q - log_m), axis=-1, keepdims=True) / si
    return kl1 + kl2


# ----------------------------------------------------------------------------- kernels
def _fused_small_kernel(t_ref, i_ref, w_ref, out_ref, *, batch, d):
    """Whole batch in one VMEM block: alpha + stacked matmul + blend fused."""
    t = t_ref[...].astype(jnp.float32)
    im = i_ref[...].astype(jnp.float32)

    alpha = jnp.sum(_kl_rows(t, im), axis=0, keepdims=True) * (0.5 / batch)   # (1,1)

    x = jnp.concatenate([t, im], axis=-1)              # lane-aligned concat in VMEM (free)
    fusion = jnp.dot(x, w_ref[...], preferred_element_type=jnp.float32)       # K=2d matmul

    # (1-a)*fusion + a*t + a*im == fusion + a*(t+im-fusion)
    out_ref[...] = (fusion + alpha * ((t + im) - fusion)).astype(out_ref.dtype)


def _alpha_kernel(t_ref, i_ref, part_ref, *, batch, tile_b, num_tiles, tiles_per_core):
    """Pass 1: per-core partial sums of the batch-wide JS numerator.

    Grid is (2, tiles_per_core); the leading axis is "parallel" so v7x's two
    TensorCores each own half the batch tiles. part_ref block is (1, d); the
    scalar partial is broadcast over its lanes (element [0, 0] is read later).
    """
    c = pl.program_id(0)
    s = pl.program_id(1)
    tile_idx = c * tiles_per_core + s

    @pl.when(s == 0)
    def _():
        part_ref[...] = jnp.zeros_like(part_ref)

    @pl.when(tile_idx < num_tiles)                     # skip clamped / duplicate tiles
    def _():
        t = t_ref[...].astype(jnp.float32)
        im = i_ref[...].astype(jnp.float32)
        kl = _kl_rows(t, im)                           # (tile_b, 1)
        # Mask garbage rows of the ragged final block (no wrapper-side pad).
        rows = jax.lax.broadcasted_iota(jnp.int32, (tile_b, 1), 0)
        valid = (rows + tile_idx * tile_b) < batch
        part = jnp.sum(jnp.where(valid, kl, 0.0), axis=0, keepdims=True)      # (1,1)
        part_ref[...] += jnp.broadcast_to(part, part_ref.shape)


def _fuse_kernel(part_ref, t_ref, i_ref, w_ref, out_ref, *, batch, d):
    """Pass 2: stacked matmul + blend for one batch tile (alpha from SMEM partials)."""
    alpha = (part_ref[0, 0] + part_ref[0, d]) * (0.5 / batch)   # combine 2-core partials
    t = t_ref[...].astype(jnp.float32)
    im = i_ref[...].astype(jnp.float32)
    x = jnp.concatenate([t, im], axis=-1)
    fusion = jnp.dot(x, w_ref[...], preferred_element_type=jnp.float32)
    out_ref[...] = (fusion + alpha * ((t + im) - fusion)).astype(out_ref.dtype)


# ----------------------------------------------------------------------------- wrapper
def stack_fusion_weights(text_weight, image_weight):
    """Do this ONCE at parameter setup: [2D, D] stacked weight for the K=2D matmul."""
    return jnp.concatenate(
        [text_weight.astype(jnp.float32), image_weight.astype(jnp.float32)], axis=0)


def fusion_forward(text, image, stacked_weight, *, tile_b=512):
    """Pallas equivalent of Fusion.forward(text, image).

    `stacked_weight` is stack_fusion_weights(text_weight, image_weight), shape (2D, D).
    """
    b, d = text.shape
    assert d == _D and image.shape == (b, d)
    assert stacked_weight.shape == (2 * d, d)
    f32 = jnp.float32
    vmem = pl.BlockSpec(memory_space=pltpu.MemorySpace.VMEM)

    if b <= tile_b:
        # Small / mid batch: single fused, grid-less call (x read once, one dispatch).
        return pl.pallas_call(
            functools.partial(_fused_small_kernel, batch=b, d=d),
            out_shape=jax.ShapeDtypeStruct((b, d), f32),
            in_specs=[vmem, vmem, vmem],
            out_specs=vmem,
        )(text, image, stacked_weight)

    # Large batch: two passes so the batchmean alpha stays exact.
    num_tiles = pl.cdiv(b, tile_b)
    tiles_per_core = pl.cdiv(num_tiles, 2)

    def tile_map(c, s):
        # Clamp so the DMA of a skipped (duplicate) tile stays in bounds.
        return (jnp.minimum(c * tiles_per_core + s, num_tiles - 1), 0)

    # Pass 1: (1, 2d) raw partial sums (one (1, d) lane-block per TensorCore).
    partials = pl.pallas_call(
        functools.partial(_alpha_kernel, batch=b, tile_b=tile_b,
                          num_tiles=num_tiles, tiles_per_core=tiles_per_core),
        out_shape=jax.ShapeDtypeStruct((1, 2 * d), f32),
        grid=(2, tiles_per_core),
        in_specs=[pl.BlockSpec((tile_b, d), tile_map),
                  pl.BlockSpec((tile_b, d), tile_map)],
        out_specs=pl.BlockSpec((1, d), lambda c, s: (0, c)),    # resident accumulator per core
        compiler_params=pltpu.CompilerParams(
            dimension_semantics=("parallel", "arbitrary")),
    )(text, image)

    # Pass 2: matmul + blend, fully parallel over batch tiles, weight VMEM-resident.
    return pl.pallas_call(
        functools.partial(_fuse_kernel, batch=b, d=d),
        out_shape=jax.ShapeDtypeStruct((b, d), f32),
        grid=(num_tiles,),
        in_specs=[
            pl.BlockSpec(memory_space=pltpu.MemorySpace.SMEM),  # (1, 2d) alpha partials
            pl.BlockSpec((tile_b, d), lambda i: (i, 0)),        # text tile
            pl.BlockSpec((tile_b, d), lambda i: (i, 0)),        # image tile
            pl.BlockSpec((2 * d, d), lambda i: (0, 0)),         # weight, VMEM-resident
        ],
        out_specs=pl.BlockSpec((tile_b, d), lambda i: (i, 0)),
        compiler_params=pltpu.CompilerParams(dimension_semantics=("parallel",)),
    )(partials, text, image, stacked_weight)


# ----------------------------------------------------------------------------- reference
def _fusion_ref(text, image, wt, wi):
    """Pure-JAX reference mirroring the PyTorch module (matmuls at full f32 precision)."""
    b = text.shape[0]
    m = (text + image) / 2.0
    log_m = jax.nn.log_softmax(m, axis=-1)
    p = jax.nn.softmax(text, axis=-1)
    q = jax.nn.softmax(image, axis=-1)
    kl1 = jnp.sum(p * (jnp.log(p) - log_m)) / b
    kl2 = jnp.sum(q * (jnp.log(q) - log_m)) / b
    alpha = 0.5 * kl1 + 0.5 * kl2
    hi = jax.lax.Precision.HIGHEST
    fusion = jnp.dot(text, wt, precision=hi) + jnp.dot(image, wi, precision=hi)
    return (1.0 - alpha) * fusion + alpha * text + alpha * image


if __name__ == "__main__":
    key = jax.random.PRNGKey(0)
    k_wt, k_wi, k_wf = jax.random.split(key, 3)

    D = _D
    text_weight = jax.random.normal(k_wt, (D, D), dtype=jnp.float32)
    image_weight = jax.random.normal(k_wi, (D, D), dtype=jnp.float32)
    fusion_weight = jax.random.normal(k_wf, (D, D), dtype=jnp.float32)  # unused in forward (as in reference)

    w_stacked = stack_fusion_weights(text_weight, image_weight)  # once, at setup

    # B=8 and B=200: grid-less fused single-block path (B=200 now avoids the
    # two-pass path thanks to tile_b=512).  B=1333: gridded two-pass path with
    # a ragged tail tile (in-kernel masking) and an odd tile count (exercises
    # the clamped 2-core alpha split).
    for B in (8, 200, 1333):
        kb = jax.random.fold_in(key, B)
        k_t, k_i = jax.random.split(kb)
        text = jax.random.normal(k_t, (B, D), dtype=jnp.float32)
        image = jax.random.normal(k_i, (B, D), dtype=jnp.float32)

        out = jax.block_until_ready(fusion_forward(text, image, w_stacked))
        ref = _fusion_ref(text, image, text_weight, image_weight)
        # atol accounts for the different MXU pass counts of the f32 matmul
        # between XLA and Mosaic (output magnitudes are ~sqrt(2D) ~ 16).
        if not jnp.allclose(out, ref, atol=2e-2, rtol=1e-3):
            err = float(jnp.max(jnp.abs(out - ref)))
            raise AssertionError(f"Pallas kernel mismatch at B={B}, max abs err={err}")

    print("KERNEL_OK")
</pallas_src>

<mosaic_0001>
module attributes {stable_mosaic.version = 11 : i64} {
  func.func @_fused_small_kernel(%arg0: memref<8x128xf32, #tpu.memory_space<vmem>>, %arg1: memref<8x128xf32, #tpu.memory_space<vmem>>, %arg2: memref<256x128xf32, #tpu.memory_space<vmem>>, %arg3: memref<8x128xf32, #tpu.memory_space<vmem>>) attributes {dimension_semantics = [], scalar_prefetch = 0 : i64, scratch_operands = 0 : i64, tpu.core_type = #tpu.core_type<tc>} {
    %c0 = arith.constant 0 : index
    %c0_0 = arith.constant 0 : index
    %0 = vector.load %arg0[%c0, %c0_0] : memref<8x128xf32, #tpu.memory_space<vmem>>, vector<8x128xf32>
    %c0_1 = arith.constant 0 : index
    %c0_2 = arith.constant 0 : index
    %1 = vector.load %arg1[%c0_1, %c0_2] : memref<8x128xf32, #tpu.memory_space<vmem>>, vector<8x128xf32>
    %cst = arith.constant dense<0xFF800000> : vector<8xf32>
    %2 = vector.multi_reduction <maximumf>, %0, %cst [1] : vector<8x128xf32> to vector<8xf32>
    %3 = vector.shape_cast %2 : vector<8xf32> to vector<8x1xf32>
    %cst_3 = arith.constant dense<0xFF800000> : vector<8xf32>
    %4 = vector.multi_reduction <maximumf>, %1, %cst_3 [1] : vector<8x128xf32> to vector<8xf32>
    %5 = vector.shape_cast %4 : vector<8xf32> to vector<8x1xf32>
    %6 = vector.broadcast %3 : vector<8x1xf32> to vector<8x128xf32>
    %7 = arith.subf %0, %6 : vector<8x128xf32>
    %8 = vector.broadcast %5 : vector<8x1xf32> to vector<8x128xf32>
    %9 = arith.subf %1, %8 : vector<8x128xf32>
    %10 = arith.addf %7, %9 : vector<8x128xf32>
    %cst_4 = arith.constant 5.000000e-01 : f32
    %11 = vector.broadcast %cst_4 : f32 to vector<8x128xf32>
    %12 = arith.mulf %10, %11 : vector<8x128xf32>
    %13 = math.exp %12 : vector<8x128xf32>
    %cst_5 = arith.constant dense<0.000000e+00> : vector<8xf32>
    %14 = vector.multi_reduction <add>, %13, %cst_5 [1] : vector<8x128xf32> to vector<8xf32>
    %15 = vector.shape_cast %14 : vector<8xf32> to vector<8x1xf32>
    %16 = math.log %15 : vector<8x1xf32>
    %17 = vector.broadcast %16 : vector<8x1xf32> to vector<8x128xf32>
    %18 = arith.subf %12, %17 : vector<8x128xf32>
    %19 = math.exp %7 : vector<8x128xf32>
    %cst_6 = arith.constant dense<0.000000e+00> : vector<8xf32>
    %20 = vector.multi_reduction <add>, %19, %cst_6 [1] : vector<8x128xf32> to vector<8xf32>
    %21 = vector.shape_cast %20 : vector<8xf32> to vector<8x1xf32>
    %22 = math.log %21 : vector<8x1xf32>
    %23 = vector.broadcast %22 : vector<8x1xf32> to vector<8x128xf32>
    %24 = arith.subf %7, %23 : vector<8x128xf32>
    %25 = math.exp %9 : vector<8x128xf32>
    %cst_7 = arith.constant dense<0.000000e+00> : vector<8xf32>
    %26 = vector.multi_reduction <add>, %25, %cst_7 [1] : vector<8x128xf32> to vector<8xf32>
    %27 = vector.shape_cast %26 : vector<8xf32> to vector<8x1xf32>
    %28 = math.log %27 : vector<8x1xf32>
    %29 = vector.broadcast %28 : vector<8x1xf32> to vector<8x128xf32>
    %30 = arith.subf %9, %29 : vector<8x128xf32>
    %31 = arith.subf %24, %18 : vector<8x128xf32>
    %32 = arith.mulf %19, %31 : vector<8x128xf32>
    %cst_8 = arith.constant dense<0.000000e+00> : vector<8xf32>
    %33 = vector.multi_reduction <add>, %32, %cst_8 [1] : vector<8x128xf32> to vector<8xf32>
    %34 = vector.shape_cast %33 : vector<8xf32> to vector<8x1xf32>
    %35 = arith.divf %34, %21 : vector<8x1xf32>
    %36 = arith.subf %30, %18 : vector<8x128xf32>
    %37 = arith.mulf %25, %36 : vector<8x128xf32>
    %cst_9 = arith.constant dense<0.000000e+00> : vector<8xf32>
    %38 = vector.multi_reduction <add>, %37, %cst_9 [1] : vector<8x128xf32> to vector<8xf32>
    %39 = vector.shape_cast %38 : vector<8xf32> to vector<8x1xf32>
    %40 = arith.divf %39, %27 : vector<8x1xf32>
    %41 = arith.addf %35, %40 : vector<8x1xf32>
    %cst_10 = arith.constant dense<0.000000e+00> : vector<1xf32>
    %42 = vector.multi_reduction <add>, %41, %cst_10 [0] : vector<8x1xf32> to vector<1xf32>
    %43 = vector.shape_cast %42 : vector<1xf32> to vector<1x1xf32>
    %cst_11 = arith.constant 6.250000e-02 : f32
    %44 = vector.broadcast %cst_11 : f32 to vector<1x1xf32>
    %45 = arith.mulf %43, %44 : vector<1x1xf32>
    %46 = tpu.concatenate %0, %1 in 1 : vector<8x128xf32>, vector<8x128xf32> -> vector<8x256xf32>
    %c0_12 = arith.constant 0 : index
    %c0_13 = arith.constant 0 : index
    %47 = vector.load %arg2[%c0_12, %c0_13] : memref<256x128xf32, #tpu.memory_space<vmem>>, vector<256x128xf32>
    %cst_14 = arith.constant dense<0.000000e+00> : vector<8x128xf32>
    %48 = tpu.matmul %46, %47, %cst_14 {dimension_numbers = #tpu.dot_dimension_numbers<[1], [0], [0], [1], [0, 0, 1, 1], [], []>} : vector<8x256xf32>, vector<256x128xf32>, vector<8x128xf32> -> vector<8x128xf32>
    %49 = arith.addf %0, %1 : vector<8x128xf32>
    %50 = arith.subf %49, %48 : vector<8x128xf32>
    %51 = vector.broadcast %45 : vector<1x1xf32> to vector<8x128xf32>
    %52 = arith.mulf %51, %50 : vector<8x128xf32>
    %53 = arith.addf %48, %52 : vector<8x128xf32>
    %c0_15 = arith.constant 0 : index
    %c0_16 = arith.constant 0 : index
    %54 = vector.load %arg3[%c0_15, %c0_16] : memref<8x128xf32, #tpu.memory_space<vmem>>, vector<8x128xf32>
    tpu.vector_store %arg3[%c0_15, %c0_16], %53 {strides = array<i32>} : memref<8x128xf32, #tpu.memory_space<vmem>>, vector<8x128xf32>,
    return
  }
}

</mosaic_0001>

<bundles_post_ra>
// kernel: tpu_custom_call.1
= control target key start
LH: loop header
LB: loop body
LE: loop exit
PB: predicated region body
PF: predicated region fallthrough
CT: control target
= control target key end

     0   :  { %8 = vsyncpa [#allocation3], 0  ;;  %s419_s0 = inlined_call_operand.hbm [shape: f32[8,128], index: 0, kind: input, shape index: {}]   ;;  %s420_s1 = inlined_call_operand.hbm [shape: f32[8,128], index: 1, kind: input, shape index: {}]   ;;  %s421_s2 = inlined_call_operand.hbm [shape: f32[256,128], index: 2, kind: input, shape index: {}]   ;;  %s422_s3 = inlined_call_operand.hbm [shape: f32[8,128], index: 3, kind: output, shape index: {}]  }
   0x1   :  { %9 = vsyncpa [#allocation6], 0 }
   0x2   :  { %10 = vsyncpa [#allocation4], 0  ;;  %s369_s12 = smov [#allocation5]   ;;  %s370_s14 = smov [#allocation2]  }
   0x3   :  { %s27_s13 = sshll.u32 %s369_s12, 4  ;;  %s17_s15 = sshll.u32 %s370_s14, 4  ;;  %s28_s13 = int_to_ptr.vmem [resolvable:$true] %s27_s13  ;;  %s18_s15 = int_to_ptr.vmem [resolvable:$true] %s17_s15 }
   0x4   :  { %s291_s16 = scalar_lea.vmem %s28_s13, 128  ;;  %p296_p1 = scmp.lt.s32.totalorder %s28_s13, %s28_s13 }
   0x5   :  { %p292_p0 = scmp.ne.s32.totalorder %s28_s13, %s291_s16  ;;  %p297_p2 = scmp.lt.s32.totalorder %s291_s16, %s291_s16 }
   0x7   :  { %p298_p3 = por %p297_p2, %p296_p1 }
   0x9   :  { %p299_p4 = pnand %p298_p3, %p292_p0 }
   0xb   :  { %302 = shalt.err (!%p299_p4)
}
   0xc   :  { %30 = dma.hbm_to_vmem [thread:$0]  %s420_s1, 128, %s28_s13, [#allocation6]  }
   0xd   :  { %s311_s19 = scalar_lea.vmem %s18_s15, 128  ;;  %p316_p6 = scmp.lt.s32.totalorder %s18_s15, %s18_s15 }
   0xe   :  { %p312_p5 = scmp.ne.s32.totalorder %s18_s15, %s311_s19  ;;  %p317_p7 = scmp.lt.s32.totalorder %s311_s19, %s311_s19 }
  0x10   :  { %p318_p8 = por %p317_p7, %p316_p6 }
  0x12   :  { %p319_p9 = pnand %p318_p8, %p312_p5 }
  0x14   :  { %322 = shalt.err (!%p319_p9)
}
  0x15   :  { %20 = dma.hbm_to_vmem [thread:$0]  %s419_s0, 128, %s18_s15, [#allocation3]  }
  0x16   :  { %s371_s22 = smov [#allocation7]  }
  0x17   :  { %s36_s23 = sshll.u32 %s371_s22, 4  ;;  %s37_s23 = int_to_ptr.vmem [resolvable:$true] %s36_s23 }
  0x18   :  { %s331_s24 = scalar_lea.vmem %s37_s23, 4096  ;;  %p336_p11 = scmp.lt.s32.totalorder %s37_s23, %s37_s23 }
  0x19   :  { %p332_p10 = scmp.ne.s32.totalorder %s37_s23, %s331_s24  ;;  %p337_p12 = scmp.lt.s32.totalorder %s331_s24, %s331_s24 }
  0x1b   :  { %p338_p13 = por %p337_p12, %p336_p11 }
  0x1d   :  { %p339_p0 = pnand %p338_p13, %p332_p10 }
  0x1f   :  { %342 = shalt.err (!%p339_p0)
}
  0x20   :  { %s372_s1 = smov 128   ;;  %s373_s25 = smov 8  }
  0x21   :  { %42 = dma.hbm_to_vmem [thread:$0]  %s421_s2, 4096, %s37_s23, [#allocation6], %s372_s1, %s372_s1, %s373_s25  }
  0x22   :  { %363 = dma.done.wait [#allocation3], 128  }
  0x23   :  { %364 = vsyncadd [#allocation3], 4294967168 }
  0x24   :  { %365 = dma.done.wait [#allocation6], 4224  }
  0x25   :  { %366 = vsyncadd [#allocation6], 4294963072  ;;  %v404_v0 = vld [vmem:[#allocation2] sm:$0xff]  ;;  %v406_v1 = vld [vmem:[#allocation5] sm:$0xff]  ;;  %s374_s0 = smov [#allocation8]  }
  0x26   :  { %54 = vmax.xlane.f32.xlu0 %v404_v0  ;;  %199 = vmatprep.mubr.f32.mxu0 %v406_v1  ;;  %v134_v2 = vld [vmem:[#allocation7 + $0xf8] sm:$0xff]  ;;  %v133_v4 = vld [vmem:[#allocation7 + $0xf0] sm:$0xff]  ;;  %v132_v6 = vld [vmem:[#allocation7 + $0xe8] sm:$0xff]  ;;  %s216_s2 = sshll.u32 %s374_s0, 4  ;;  %s217_s2 = int_to_ptr.vmem [resolvable:$true] %s216_s2 }
  0x27   :  { %v118_v3 = vld [vmem:[#allocation7 + $0x78] sm:$0xff]  ;;  %226 = vmatprep.subr.mxu0 %v134_v2  ;;  %v117_v5 = vld [vmem:[#allocation7 + $0x70] sm:$0xff]  ;;  %v116_v7 = vld [vmem:[#allocation7 + $0x68] sm:$0xff]  ;;  %s343_s28 = scalar_lea.vmem %s217_s2, 128  ;;  %p348_p2 = scmp.lt.s32.totalorder %s217_s2, %s217_s2 }
  0x28   :  { %227 = vmatpush3.msra.mxu0 %v118_v3  ;;  %v131_v8 = vld [vmem:[#allocation7 + $0xe0] sm:$0xff]  ;;  %v130_v10 = vld [vmem:[#allocation7 + $0xd8] sm:$0xff]  ;;  %v129_v12 = vld [vmem:[#allocation7 + $0xd0] sm:$0xff]  ;;  %p344_p1 = scmp.ne.s32.totalorder %s217_s2, %s343_s28  ;;  %p349_p3 = scmp.lt.s32.totalorder %s343_s28, %s343_s28 }
  0x29   :  { %228 = vmatprep.subr.mxu0 %v133_v4  ;;  %v115_v9 = vld [vmem:[#allocation7 + $0x60] sm:$0xff]  ;;  %v114_v11 = vld [vmem:[#allocation7 + $0x58] sm:$0xff]  ;;  %v113_v13 = vld [vmem:[#allocation7 + $0x50] sm:$0xff] }
  0x2a   :  { %56 = vmax.xlane.f32.xlu0 %v406_v1  ;;  %229 = vmatpush3.msra.mxu0 %v117_v5  ;;  %v128_v14 = vld [vmem:[#allocation7 + $0xc8] sm:$0xff]  ;;  %v127_v16 = vld [vmem:[#allocation7 + $0xc0] sm:$0xff]  ;;  %v126_v18 = vld [vmem:[#allocation7 + $0xb8] sm:$0xff]  ;;  %p350_p4 = por %p349_p3, %p348_p2 }
  0x2b   :  { %230 = vmatprep.subr.mxu0 %v132_v6  ;;  %v112_v15 = vld [vmem:[#allocation7 + $0x48] sm:$0xff]  ;;  %v111_v17 = vld [vmem:[#allocation7 + $0x40] sm:$0xff]  ;;  %v110_v19 = vld [vmem:[#allocation7 + $0x38] sm:$0xff] }
  0x2c   :  { %231 = vmatpush3.msra.mxu0 %v116_v7  ;;  %v125_v20 = vld [vmem:[#allocation7 + $0xb0] sm:$0xff]  ;;  %v124_v22 = vld [vmem:[#allocation7 + $0xa8] sm:$0xff]  ;;  %v123_v24 = vld [vmem:[#allocation7 + $0xa0] sm:$0xff]  ;;  %p351_p5 = pnand %p350_p4, %p344_p1 }
  0x2d   :  { %232 = vmatprep.subr.mxu0 %v131_v8  ;;  %v109_v21 = vld [vmem:[#allocation7 + $0x30] sm:$0xff]  ;;  %v108_v23 = vld [vmem:[#allocation7 + $0x28] sm:$0xff]  ;;  %v107_v25 = vld [vmem:[#allocation7 + $0x20] sm:$0xff] }
  0x2e   :  { %233 = vmatpush3.msra.mxu0 %v115_v9  ;;  %v122_v26 = vld [vmem:[#allocation7 + $0x98] sm:$0xff]  ;;  %v121_v28 = vld [vmem:[#allocation7 + $0x90] sm:$0xff]  ;;  %v120_v30 = vld [vmem:[#allocation7 + $0x88] sm:$0xff] }
  0x2f   :  { %234 = vmatprep.subr.mxu0 %v130_v10  ;;  %v106_v27 = vld [vmem:[#allocation7 + $0x18] sm:$0xff]  ;;  %v105_v29 = vld [vmem:[#allocation7 + $0x10] sm:$0xff]  ;;  %v104_v31 = vld [vmem:[#allocation7 + $0x8] sm:$0xff] }
  0x30   :  { %235 = vmatpush3.msra.mxu0 %v114_v11  ;;  %v119_v32 = vld [vmem:[#allocation7 + $0x80] sm:$0xff] }
  0x31   :  { %236 = vmatprep.subr.mxu0 %v129_v12  ;;  %v103_v33 = vld [vmem:[#allocation7] sm:$0xff] }
  0x32   :  { %237 = vmatpush3.msra.mxu0 %v113_v13 }
  0x33   :  { %238 = vmatprep.subr.mxu0 %v128_v14 }
  0x34   :  { %239 = vmatpush3.msra.mxu0 %v112_v15  ;;  %v205_v15 = vadd.f32 %v406_v1, %v404_v0 }
  0x35   :  { %240 = vmatprep.subr.mxu0 %v127_v16 }
  0x36   :  { %241 = vmatpush3.msra.mxu0 %v111_v17 }
  0x37   :  { %242 = vmatprep.subr.mxu0 %v126_v18 }
  0x38   :  { %243 = vmatpush3.msra.mxu0 %v110_v19 }
  0x39   :  { %244 = vmatprep.subr.mxu0 %v125_v20 }
  0x3a   :  { %245 = vmatpush3.msra.mxu0 %v109_v21 }
  0x3b   :  { %246 = vmatprep.subr.mxu0 %v124_v22 }
  0x3c   :  { %247 = vmatpush3.msra.mxu0 %v108_v23 }
  0x3d   :  { %248 = vmatprep.subr.mxu0 %v123_v24 }
  0x3e   :  { %249 = vmatpush3.msra.mxu0 %v107_v25 }
  0x3f   :  { %250 = vmatprep.subr.mxu0 %v122_v26 }
  0x40   :  { %251 = vmatpush3.msra.mxu0 %v106_v27 }
  0x41   :  { %252 = vmatprep.subr.mxu0 %v121_v28 }
  0x42   :  { %253 = vmatpush3.msra.mxu0 %v105_v29 }
  0x43   :  { %254 = vmatprep.subr.mxu0 %v120_v30 }
  0x44   :  { %255 = vmatpush3.msra.mxu0 %v104_v31 }
  0x45   :  { %256 = vmatprep.subr.mxu0 %v119_v32 }
  0x46   :  { %257 = vmatpush3.msra.mxu0 %v103_v33 }
  0x47   :  { %200 = vmatmul.mubr.f32.vlgmr.msra.gmra.mxu0 %v404_v0 }
  0xaf   :  { %v55_v34 = vpop.xlane.xlu0 %54 }
  0xb0   :  { %v58_v36 = vsub.f32 %v404_v0, %v55_v34 }
  0xb2   :  { %v69_v42 = vmul.f32 1.442695, %v58_v36 }
  0xb3   :  { %v57_v35 = vpop.xlane.xlu0 %56 }
  0xb4   :  { %v59_v37 = vsub.f32 %v406_v1, %v57_v35 }
  0xb6   :  { %v60_v38 = vadd.f32 %v59_v37, %v58_v36  ;;  %v76_v39 = vmul.f32 1.442695, %v59_v37 }
  0xb8   :  { %267 = vpow2.f32 %v76_v39  ;;  %v61_v40 = vmul.f32 0.5, %v60_v38 }
  0xba   :  { %v62_v41 = vmul.f32 1.442695, %v61_v40 }
  0xbc   :  { %269 = vpow2.f32 %v62_v41 }
  0xbd   :  { %271 = vpow2.f32 %v69_v42 }
  0xc5   :  { %v268_v43 = vpop.eup %267 }
  0xc6   :  { %78 = vadd.xlane.f32.xlu0 %v268_v43 }
  0xc9   :  { %v270_v44 = vpop.eup %269 }
  0xca   :  { %64 = vadd.xlane.f32.xlu1 %v270_v44  ;;  %v272_v45 = vpop.eup %271 }
  0xce   :  { %71 = vadd.xlane.f32.xlu1 %v272_v45 }
 0x107   :  { %v258_v8 = vpop.f32.mrf.mxu0 }
 0x109   :  { %v259_v11 = vpop.f32.mrf.mxu0 }
 0x10a   :  { %v260_v14 = vadd.f32 %v259_v11, %v258_v8 }
 0x10c   :  { %v206_v18 = vsub.f32 %v205_v15, %v260_v14 }
 0x14f   :  { %v79_v46 = vpop.xlane.xlu0 %78 }
 0x150   :  { %273 = vlog2.f32 %v79_v46 }
 0x153   :  { %v65_v47 = vpop.xlane.xlu1 %64 }
 0x154   :  { %275 = vlog2.f32 %v65_v47 }
 0x157   :  { %v72_v48 = vpop.xlane.xlu1 %71 }
 0x158   :  { %277 = vlog2.f32 %v72_v48 }
 0x159   :  { %279 = vrcp.f32 %v79_v46 }
 0x15a   :  { %281 = vrcp.f32 %v72_v48 }
 0x15d   :  { %v274_v49 = vpop.eup %273 }
 0x15e   :  { %v81_v50 = vmul.f32 0.6931472, %v274_v49 }
 0x160   :  { %v82_v54 = vsub.f32 %v59_v37, %v81_v50 }
 0x161   :  { %v276_v51 = vpop.eup %275 }
 0x162   :  { %v67_v52 = vmul.f32 0.6931472, %v276_v51 }
 0x164   :  { %v68_v53 = vsub.f32 %v61_v40, %v67_v52 }
 0x165   :  { %v278_v55 = vpop.eup %277 }
 0x166   :  { %v74_v56 = vmul.f32 0.6931472, %v278_v55  ;;  %v89_v57 = vsub.f32 %v82_v54, %v68_v53  ;;  %v280_v63 = vpop.eup %279 }
 0x167   :  { %v282_v2 = vpop.eup %281 }
 0x168   :  { %v90_v58 = vmul.f32 %v268_v43, %v89_v57  ;;  %v75_v59 = vsub.f32 %v58_v36, %v74_v56 }
 0x16a   :  { %91 = vadd.xlane.f32.xlu0 %v90_v58  ;;  %v83_v60 = vsub.f32 %v75_v59, %v68_v53 }
 0x16c   :  { %v84_v61 = vmul.f32 %v272_v45, %v83_v60 }
 0x16e   :  { %85 = vadd.xlane.f32.xlu1 %v84_v61 }
 0x1f3   :  { %v92_v62 = vpop.xlane.xlu0 %91 }
 0x1f4   :  { %v94_v4 = vmul.f32 %v280_v63, %v92_v62 }
 0x1f7   :  { %v86_v3 = vpop.xlane.xlu1 %85 }
 0x1f8   :  { %v88_v5 = vmul.f32 %v282_v2, %v86_v3 }
 0x1fa   :  { %v95_v6 = vadd.f32 %v94_v4, %v88_v5 }
 0x1fc   :  { %v96_v7 = vrot.slane %v95_v6, 4 }
 0x1fe   :  { %v97_v9 = vadd.f32 %v96_v7, %v95_v6 }
 0x200   :  { %v98_v10 = vrot.slane %v97_v9, 2 }
 0x202   :  { %v99_v12 = vadd.f32 %v98_v10, %v97_v9 }
 0x204   :  { %v100_v13 = vrot.slane %v99_v12, 1 }
 0x206   :  { %v101_v16 = vadd.f32 %v100_v13, %v99_v12 }
 0x208   :  { %v102_v17 = vmul.f32 0.0625, %v101_v16 }
 0x20a   :  { %v207_v19 = vmul.f32 %v206_v18, %v102_v17 }
 0x20c   :  { %v208_v20 = vadd.f32 %v260_v14, %v207_v19 }
 0x20e   :  { %209 = vst [vmem:[#allocation8] sm:$0xff] %v208_v20 }
 0x20f   :  { %354 = shalt.err (!%p351_p5)
}
 0x210   :  { %219 = dma.vmem_to_hbm [thread:$0]  %s217_s2, 128, %s422_s3, [#allocation4]  }
 0x211   :  { %367 = dma.done.wait [#allocation4], 128  }
 0x212   :  { %368 = vsyncadd [#allocation4], 4294967168 }
 0x213   :  { %223 = vsyncpa [#allocation3], 1 }
 0x214   :  { %224 = vsyncpa [#allocation6], 1 }
 0x215   :  { %225 = vsyncpa [#allocation4], 1 }

</bundles_post_ra>
